<compile_context>
chip_gen: v6e
topology: v6e:2x2x1
jax: 0.10.0
libtpu: 0.0.40
codegen_flags: <defaults>
</compile_context>

<pallas_src>
import functools
import math

import jax
import jax.numpy as jnp
from jax.experimental import pallas as pl
from jax.experimental.pallas import tpu as pltpu

LN_EPS = 1e-5


def _layernorm(y, gamma, beta):
    mean = jnp.mean(y, axis=-1, keepdims=True)
    var = jnp.mean((y - mean) ** 2, axis=-1, keepdims=True)
    return (y - mean) * jax.lax.rsqrt(var + LN_EPS) * gamma + beta


# ---------------------------------------------------------------------------
# Fused kernel: QKV proj -> per-head attention -> out-proj accumulate ->
#               residual + LN1 -> FFN -> residual + LN2.
# One grid step = one batch element with the full (S, D) tile resident in VMEM.
# ---------------------------------------------------------------------------
def encoder_layer_kernel(x_ref, wqkv_ref, bqkv_ref, wo_ref, bo_ref,
                         g1_ref, be1_ref,
                         w1_ref, b1_ref, w2_ref, b2_ref,
                         g2_ref, be2_ref,
                         o_ref, *, num_heads, d_k):
    x = x_ref[0]                                   # (S, D) f32
    D = num_heads * d_k
    x_bf = x.astype(jnp.bfloat16)

    # Fused Q/K/V projection (scale already folded into Wq/bq).
    qkv = jnp.dot(x_bf, wqkv_ref[...],
                  preferred_element_type=jnp.float32) + bqkv_ref[...]   # (S, 3D) f32
    q = qkv[:, :D].astype(jnp.bfloat16)
    k = qkv[:, D:2 * D].astype(jnp.bfloat16)
    v = qkv[:, 2 * D:].astype(jnp.bfloat16)

    wo = wo_ref[...]                               # (D, D) bf16, loaded once

    # Per-head attention, accumulating directly into the output projection
    # (avoids the lane-axis concatenate of narrow head chunks).
    attn = jnp.zeros_like(x)                       # (S, D) f32 accumulator
    for hd in range(num_heads):                    # static unroll (static slices)
        sl = slice(hd * d_k, (hd + 1) * d_k)
        qh, kh, vh = q[:, sl], k[:, sl], v[:, sl]
        s = jnp.dot(qh, kh.T, preferred_element_type=jnp.float32)       # (S, S) f32
        s = s - jnp.max(s, axis=-1, keepdims=True)
        p = jnp.exp(s)
        p = p * pl.reciprocal(jnp.sum(p, axis=-1, keepdims=True), approx=True)
        hout = jnp.dot(p.astype(jnp.bfloat16), vh,
                       preferred_element_type=jnp.float32)              # (S, d_k)
        attn = attn + jnp.dot(hout.astype(jnp.bfloat16), wo[sl, :],
                              preferred_element_type=jnp.float32)       # (S, D)

    # Residual #1 + LayerNorm (f32).
    y1 = _layernorm(x + attn + bo_ref[...], g1_ref[...], be1_ref[...])

    # Position-wise FFN: Linear -> ReLU -> Linear, residual #2 + LayerNorm.
    h = jnp.dot(y1.astype(jnp.bfloat16), w1_ref[...],
                preferred_element_type=jnp.float32) + b1_ref[...]
    h = jnp.maximum(h, 0.0)
    f = jnp.dot(h.astype(jnp.bfloat16), w2_ref[...],
                preferred_element_type=jnp.float32) + b2_ref[...]

    # NOTE: with D=32 the output stores use 32/128 lanes; a (1, S*D) lane-dense
    # repack would help only if the bundle shows the epilogue is store-bound.
    o_ref[0] = _layernorm(y1 + f, g2_ref[...], be2_ref[...])


# ---------------------------------------------------------------------------
# Wrapper
# ---------------------------------------------------------------------------
def _const_spec(shape):
    # Whole-array block, replicated across the batch grid.
    return pl.BlockSpec(shape, lambda b, _s=shape: tuple(0 for _ in _s))


def encoder_layer(x, p, *, num_heads, d_k):
    B, S, D = x.shape
    d_ff = p["w1"].shape[1]
    kern = functools.partial(encoder_layer_kernel, num_heads=num_heads, d_k=d_k)
    return pl.pallas_call(
        kern,
        out_shape=jax.ShapeDtypeStruct((B, S, D), jnp.float32),
        grid_spec=pltpu.PrefetchScalarGridSpec(
            num_scalar_prefetch=0,
            grid=(B,),                                    # 2-way "parallel" axis (v7x 2 TCs)
            in_specs=[
                pl.BlockSpec((1, S, D), lambda b: (b, 0, 0)),   # x
                _const_spec((D, 3 * D)), _const_spec((1, 3 * D)),   # Wqkv (bf16), bqkv
                _const_spec((D, D)),     _const_spec((1, D)),       # Wo (bf16), bo
                _const_spec((1, D)),     _const_spec((1, D)),       # ln1 gamma, beta
                _const_spec((D, d_ff)),  _const_spec((1, d_ff)),    # W1 (bf16), b1
                _const_spec((d_ff, D)),  _const_spec((1, D)),       # W2 (bf16), b2
                _const_spec((1, D)),     _const_spec((1, D)),       # ln2 gamma, beta
            ],
            out_specs=pl.BlockSpec((1, S, D), lambda b: (b, 0, 0)),
        ),
        compiler_params=pltpu.CompilerParams(
            dimension_semantics=("parallel",),
            vmem_limit_bytes=64 * 1024 * 1024,
        ),
    )(x, p["wqkv"], p["bqkv"], p["wo"], p["bo"],
      p["ln1_g"], p["ln1_b"],
      p["w1"], p["b1"], p["w2"], p["b2"],
      p["ln2_g"], p["ln2_b"])


# ---------------------------------------------------------------------------
# Parameters
# ---------------------------------------------------------------------------
def init_params(key, d_model, d_ff):
    ks = jax.random.split(key, 6)

    def lin(k, fan_in, fan_out):
        bound = 1.0 / (fan_in ** 0.5)
        return jax.random.uniform(k, (fan_in, fan_out), jnp.float32, -bound, bound)

    return {
        "wq": lin(ks[0], d_model, d_model), "bq": jnp.zeros((1, d_model), jnp.float32),
        "wk": lin(ks[1], d_model, d_model), "bk": jnp.zeros((1, d_model), jnp.float32),
        "wv": lin(ks[2], d_model, d_model), "bv": jnp.zeros((1, d_model), jnp.float32),
        "wo": lin(ks[3], d_model, d_model), "bo": jnp.zeros((1, d_model), jnp.float32),
        "w1": lin(ks[4], d_model, d_ff),    "b1": jnp.zeros((1, d_ff), jnp.float32),
        "w2": lin(ks[5], d_ff, d_model),    "b2": jnp.zeros((1, d_model), jnp.float32),
        "ln1_g": jnp.ones((1, d_model), jnp.float32),
        "ln1_b": jnp.zeros((1, d_model), jnp.float32),
        "ln2_g": jnp.ones((1, d_model), jnp.float32),
        "ln2_b": jnp.zeros((1, d_model), jnp.float32),
    }


def prepare_params(p, *, d_k):
    """Fuse QKV weights, fold the 1/sqrt(d_k) scale into Wq/bq, cast matmul
    weights to bf16 (biases / LN params stay f32)."""
    scale = 1.0 / math.sqrt(d_k)
    wqkv = jnp.concatenate([p["wq"] * scale, p["wk"], p["wv"]], axis=1)
    bqkv = jnp.concatenate([p["bq"] * scale, p["bk"], p["bv"]], axis=1)
    return {
        "wqkv": wqkv.astype(jnp.bfloat16), "bqkv": bqkv,
        "wo": p["wo"].astype(jnp.bfloat16), "bo": p["bo"],
        "w1": p["w1"].astype(jnp.bfloat16), "b1": p["b1"],
        "w2": p["w2"].astype(jnp.bfloat16), "b2": p["b2"],
        "ln1_g": p["ln1_g"], "ln1_b": p["ln1_b"],
        "ln2_g": p["ln2_g"], "ln2_b": p["ln2_b"],
    }


# ---------------------------------------------------------------------------
# Pure-JAX f32 reference (for correctness check)
# ---------------------------------------------------------------------------
def reference_forward(x, p, *, num_heads, d_k):
    B, S, D = x.shape
    scale = 1.0 / math.sqrt(d_k)
    q = x @ p["wq"] + p["bq"]
    k = x @ p["wk"] + p["bk"]
    v = x @ p["wv"] + p["bv"]
    qh = q.reshape(B, S, num_heads, d_k).transpose(0, 2, 1, 3)
    kh = k.reshape(B, S, num_heads, d_k).transpose(0, 2, 1, 3)
    vh = v.reshape(B, S, num_heads, d_k).transpose(0, 2, 1, 3)
    s = jnp.einsum("bhqd,bhkd->bhqk", qh, kh) * scale
    pa = jax.nn.softmax(s, axis=-1)
    o = jnp.einsum("bhqk,bhkd->bhqd", pa, vh).transpose(0, 2, 1, 3).reshape(B, S, D)
    attn = o @ p["wo"] + p["bo"]
    y1 = _layernorm(x + attn, p["ln1_g"], p["ln1_b"])
    h = jnp.maximum(y1 @ p["w1"] + p["b1"], 0.0)
    return _layernorm(y1 + h @ p["w2"] + p["b2"], p["ln2_g"], p["ln2_b"])


if __name__ == "__main__":
    # Small shapes consistent with the module: h=4 heads, d_model=32 -> d_k=d_v=8.
    B, S, D, H = 2, 8, 32, 4
    D_K = D // H
    D_FF = 4 * D  # TODO(synk): PositionwiseFeedForward hidden size not given in spec; using 4*d_model.

    key = jax.random.PRNGKey(0)
    kx, kp = jax.random.split(key)
    x = jax.random.normal(kx, (B, S, D), jnp.float32)
    raw_params = init_params(kp, D, D_FF)
    params = prepare_params(raw_params, d_k=D_K)

    out = encoder_layer(x, params, num_heads=H, d_k=D_K)
    jax.block_until_ready(out)

    assert out.shape == (B, S, D) and out.dtype == jnp.float32
    ref = reference_forward(x, raw_params, num_heads=H, d_k=D_K)
    assert jnp.allclose(out, ref, atol=1e-1, rtol=1e-1), "mismatch vs f32 reference"
    print("KERNEL_OK")
</pallas_src>

<mosaic_0001>
module attributes {stable_mosaic.version = 11 : i64} {
  func.func @encoder_layer_kernel(%arg0: i32, %arg1: memref<1x8x32xf32, #tpu.memory_space<vmem>>, %arg2: memref<32x96xbf16, #tpu.memory_space<vmem>>, %arg3: memref<1x96xf32, #tpu.memory_space<vmem>>, %arg4: memref<32x32xbf16, #tpu.memory_space<vmem>>, %arg5: memref<1x32xf32, #tpu.memory_space<vmem>>, %arg6: memref<1x32xf32, #tpu.memory_space<vmem>>, %arg7: memref<1x32xf32, #tpu.memory_space<vmem>>, %arg8: memref<32x128xbf16, #tpu.memory_space<vmem>>, %arg9: memref<1x128xf32, #tpu.memory_space<vmem>>, %arg10: memref<128x32xbf16, #tpu.memory_space<vmem>>, %arg11: memref<1x32xf32, #tpu.memory_space<vmem>>, %arg12: memref<1x32xf32, #tpu.memory_space<vmem>>, %arg13: memref<1x32xf32, #tpu.memory_space<vmem>>, %arg14: memref<1x8x32xf32, #tpu.memory_space<vmem>>) attributes {dimension_semantics = [#tpu.dimension_semantics<parallel>], iteration_bounds = array<i64: 2>, scalar_prefetch = 0 : i64, scratch_operands = 0 : i64, tpu.core_type = #tpu.core_type<tc>, window_params = [{transform_indices = @transform_0, window_bounds = array<i64: 1, 8, 32>}, {pipeline_mode = #tpu.pipeline_mode<synchronous>, transform_indices = @transform_1, window_bounds = array<i64: 32, 96>}, {pipeline_mode = #tpu.pipeline_mode<synchronous>, transform_indices = @transform_2, window_bounds = array<i64: 1, 96>}, {pipeline_mode = #tpu.pipeline_mode<synchronous>, transform_indices = @transform_3, window_bounds = array<i64: 32, 32>}, {pipeline_mode = #tpu.pipeline_mode<synchronous>, transform_indices = @transform_4, window_bounds = array<i64: 1, 32>}, {pipeline_mode = #tpu.pipeline_mode<synchronous>, transform_indices = @transform_5, window_bounds = array<i64: 1, 32>}, {pipeline_mode = #tpu.pipeline_mode<synchronous>, transform_indices = @transform_6, window_bounds = array<i64: 1, 32>}, {pipeline_mode = #tpu.pipeline_mode<synchronous>, transform_indices = @transform_7, window_bounds = array<i64: 32, 128>}, {pipeline_mode = #tpu.pipeline_mode<synchronous>, transform_indices = @transform_8, window_bounds = array<i64: 1, 128>}, {pipeline_mode = #tpu.pipeline_mode<synchronous>, transform_indices = @transform_9, window_bounds = array<i64: 128, 32>}, {pipeline_mode = #tpu.pipeline_mode<synchronous>, transform_indices = @transform_10, window_bounds = array<i64: 1, 32>}, {pipeline_mode = #tpu.pipeline_mode<synchronous>, transform_indices = @transform_11, window_bounds = array<i64: 1, 32>}, {pipeline_mode = #tpu.pipeline_mode<synchronous>, transform_indices = @transform_12, window_bounds = array<i64: 1, 32>}, {transform_indices = @transform_13, window_bounds = array<i64: 1, 8, 32>}]} {
    %c0 = arith.constant 0 : index
    %c0_0 = arith.constant 0 : index
    %c0_1 = arith.constant 0 : index
    %0 = vector.load %arg1[%c0, %c0_0, %c0_1] : memref<1x8x32xf32, #tpu.memory_space<vmem>>, vector<1x8x32xf32>
    %1 = vector.shape_cast %0 : vector<1x8x32xf32> to vector<8x32xf32>
    %2 = arith.truncf %1 : vector<8x32xf32> to vector<8x32xbf16>
    %c0_2 = arith.constant 0 : index
    %c0_3 = arith.constant 0 : index
    %3 = vector.load %arg2[%c0_2, %c0_3] : memref<32x96xbf16, #tpu.memory_space<vmem>>, vector<32x96xbf16>
    %cst = arith.constant dense<0.000000e+00> : vector<8x96xf32>
    %4 = tpu.matmul %2, %3, %cst {dimension_numbers = #tpu.dot_dimension_numbers<[1], [0], [0], [1], [0, 0, 1, 1], [], []>} : vector<8x32xbf16>, vector<32x96xbf16>, vector<8x96xf32> -> vector<8x96xf32>
    %c0_4 = arith.constant 0 : index
    %c0_5 = arith.constant 0 : index
    %5 = vector.load %arg3[%c0_4, %c0_5] : memref<1x96xf32, #tpu.memory_space<vmem>>, vector<1x96xf32>
    %6 = vector.broadcast %5 : vector<1x96xf32> to vector<8x96xf32>
    %7 = arith.addf %4, %6 : vector<8x96xf32>
    %8 = vector.extract_strided_slice %7 {offsets = [0, 0], sizes = [8, 32], strides = [1, 1]} : vector<8x96xf32> to vector<8x32xf32>
    %9 = arith.truncf %8 : vector<8x32xf32> to vector<8x32xbf16>
    %10 = vector.extract_strided_slice %7 {offsets = [0, 32], sizes = [8, 32], strides = [1, 1]} : vector<8x96xf32> to vector<8x32xf32>
    %11 = arith.truncf %10 : vector<8x32xf32> to vector<8x32xbf16>
    %12 = vector.extract_strided_slice %7 {offsets = [0, 64], sizes = [8, 32], strides = [1, 1]} : vector<8x96xf32> to vector<8x32xf32>
    %13 = arith.truncf %12 : vector<8x32xf32> to vector<8x32xbf16>
    %c0_6 = arith.constant 0 : index
    %c0_7 = arith.constant 0 : index
    %14 = vector.load %arg4[%c0_6, %c0_7] : memref<32x32xbf16, #tpu.memory_space<vmem>>, vector<32x32xbf16>
    %cst_8 = arith.constant 0.000000e+00 : f32
    %15 = vector.broadcast %cst_8 : f32 to vector<8x32xf32>
    %16 = vector.extract_strided_slice %9 {offsets = [0, 0], sizes = [8, 8], strides = [1, 1]} : vector<8x32xbf16> to vector<8x8xbf16>
    %17 = vector.extract_strided_slice %11 {offsets = [0, 0], sizes = [8, 8], strides = [1, 1]} : vector<8x32xbf16> to vector<8x8xbf16>
    %18 = vector.extract_strided_slice %13 {offsets = [0, 0], sizes = [8, 8], strides = [1, 1]} : vector<8x32xbf16> to vector<8x8xbf16>
    %19 = tpu.transpose %17, [1, 0] : vector<8x8xbf16> -> vector<8x8xbf16>
    %cst_9 = arith.constant dense<0.000000e+00> : vector<8x8xf32>
    %20 = tpu.matmul %16, %19, %cst_9 {dimension_numbers = #tpu.dot_dimension_numbers<[1], [0], [0], [1], [0, 0, 1, 1], [], []>} : vector<8x8xbf16>, vector<8x8xbf16>, vector<8x8xf32> -> vector<8x8xf32>
    %cst_10 = arith.constant dense<0xFF800000> : vector<8xf32>
    %21 = vector.multi_reduction <maximumf>, %20, %cst_10 [1] : vector<8x8xf32> to vector<8xf32>
    %22 = vector.shape_cast %21 : vector<8xf32> to vector<8x1xf32>
    %23 = vector.broadcast %22 : vector<8x1xf32> to vector<8x8xf32>
    %24 = arith.subf %20, %23 : vector<8x8xf32>
    %25 = math.exp %24 : vector<8x8xf32>
    %cst_11 = arith.constant dense<0.000000e+00> : vector<8xf32>
    %26 = vector.multi_reduction <add>, %25, %cst_11 [1] : vector<8x8xf32> to vector<8xf32>
    %27 = vector.shape_cast %26 : vector<8xf32> to vector<8x1xf32>
    %28 = tpu.reciprocal %27 {approx = true} : vector<8x1xf32> -> vector<8x1xf32>
    %29 = vector.broadcast %28 : vector<8x1xf32> to vector<8x8xf32>
    %30 = arith.mulf %25, %29 : vector<8x8xf32>
    %31 = arith.truncf %30 : vector<8x8xf32> to vector<8x8xbf16>
    %cst_12 = arith.constant dense<0.000000e+00> : vector<8x8xf32>
    %32 = tpu.matmul %31, %18, %cst_12 {dimension_numbers = #tpu.dot_dimension_numbers<[1], [0], [0], [1], [0, 0, 1, 1], [], []>} : vector<8x8xbf16>, vector<8x8xbf16>, vector<8x8xf32> -> vector<8x8xf32>
    %33 = arith.truncf %32 : vector<8x8xf32> to vector<8x8xbf16>
    %34 = vector.extract_strided_slice %14 {offsets = [0, 0], sizes = [8, 32], strides = [1, 1]} : vector<32x32xbf16> to vector<8x32xbf16>
    %cst_13 = arith.constant dense<0.000000e+00> : vector<8x32xf32>
    %35 = tpu.matmul %33, %34, %cst_13 {dimension_numbers = #tpu.dot_dimension_numbers<[1], [0], [0], [1], [0, 0, 1, 1], [], []>} : vector<8x8xbf16>, vector<8x32xbf16>, vector<8x32xf32> -> vector<8x32xf32>
    %36 = arith.addf %15, %35 : vector<8x32xf32>
    %37 = vector.extract_strided_slice %9 {offsets = [0, 8], sizes = [8, 8], strides = [1, 1]} : vector<8x32xbf16> to vector<8x8xbf16>
    %38 = vector.extract_strided_slice %11 {offsets = [0, 8], sizes = [8, 8], strides = [1, 1]} : vector<8x32xbf16> to vector<8x8xbf16>
    %39 = vector.extract_strided_slice %13 {offsets = [0, 8], sizes = [8, 8], strides = [1, 1]} : vector<8x32xbf16> to vector<8x8xbf16>
    %40 = tpu.transpose %38, [1, 0] : vector<8x8xbf16> -> vector<8x8xbf16>
    %cst_14 = arith.constant dense<0.000000e+00> : vector<8x8xf32>
    %41 = tpu.matmul %37, %40, %cst_14 {dimension_numbers = #tpu.dot_dimension_numbers<[1], [0], [0], [1], [0, 0, 1, 1], [], []>} : vector<8x8xbf16>, vector<8x8xbf16>, vector<8x8xf32> -> vector<8x8xf32>
    %cst_15 = arith.constant dense<0xFF800000> : vector<8xf32>
    %42 = vector.multi_reduction <maximumf>, %41, %cst_15 [1] : vector<8x8xf32> to vector<8xf32>
    %43 = vector.shape_cast %42 : vector<8xf32> to vector<8x1xf32>
    %44 = vector.broadcast %43 : vector<8x1xf32> to vector<8x8xf32>
    %45 = arith.subf %41, %44 : vector<8x8xf32>
    %46 = math.exp %45 : vector<8x8xf32>
    %cst_16 = arith.constant dense<0.000000e+00> : vector<8xf32>
    %47 = vector.multi_reduction <add>, %46, %cst_16 [1] : vector<8x8xf32> to vector<8xf32>
    %48 = vector.shape_cast %47 : vector<8xf32> to vector<8x1xf32>
    %49 = tpu.reciprocal %48 {approx = true} : vector<8x1xf32> -> vector<8x1xf32>
    %50 = vector.broadcast %49 : vector<8x1xf32> to vector<8x8xf32>
    %51 = arith.mulf %46, %50 : vector<8x8xf32>
    %52 = arith.truncf %51 : vector<8x8xf32> to vector<8x8xbf16>
    %cst_17 = arith.constant dense<0.000000e+00> : vector<8x8xf32>
    %53 = tpu.matmul %52, %39, %cst_17 {dimension_numbers = #tpu.dot_dimension_numbers<[1], [0], [0], [1], [0, 0, 1, 1], [], []>} : vector<8x8xbf16>, vector<8x8xbf16>, vector<8x8xf32> -> vector<8x8xf32>
    %54 = arith.truncf %53 : vector<8x8xf32> to vector<8x8xbf16>
    %55 = vector.extract_strided_slice %14 {offsets = [8, 0], sizes = [8, 32], strides = [1, 1]} : vector<32x32xbf16> to vector<8x32xbf16>
    %cst_18 = arith.constant dense<0.000000e+00> : vector<8x32xf32>
    %56 = tpu.matmul %54, %55, %cst_18 {dimension_numbers = #tpu.dot_dimension_numbers<[1], [0], [0], [1], [0, 0, 1, 1], [], []>} : vector<8x8xbf16>, vector<8x32xbf16>, vector<8x32xf32> -> vector<8x32xf32>
    %57 = arith.addf %36, %56 : vector<8x32xf32>
    %58 = vector.extract_strided_slice %9 {offsets = [0, 16], sizes = [8, 8], strides = [1, 1]} : vector<8x32xbf16> to vector<8x8xbf16>
    %59 = vector.extract_strided_slice %11 {offsets = [0, 16], sizes = [8, 8], strides = [1, 1]} : vector<8x32xbf16> to vector<8x8xbf16>
    %60 = vector.extract_strided_slice %13 {offsets = [0, 16], sizes = [8, 8], strides = [1, 1]} : vector<8x32xbf16> to vector<8x8xbf16>
    %61 = tpu.transpose %59, [1, 0] : vector<8x8xbf16> -> vector<8x8xbf16>
    %cst_19 = arith.constant dense<0.000000e+00> : vector<8x8xf32>
    %62 = tpu.matmul %58, %61, %cst_19 {dimension_numbers = #tpu.dot_dimension_numbers<[1], [0], [0], [1], [0, 0, 1, 1], [], []>} : vector<8x8xbf16>, vector<8x8xbf16>, vector<8x8xf32> -> vector<8x8xf32>
    %cst_20 = arith.constant dense<0xFF800000> : vector<8xf32>
    %63 = vector.multi_reduction <maximumf>, %62, %cst_20 [1] : vector<8x8xf32> to vector<8xf32>
    %64 = vector.shape_cast %63 : vector<8xf32> to vector<8x1xf32>
    %65 = vector.broadcast %64 : vector<8x1xf32> to vector<8x8xf32>
    %66 = arith.subf %62, %65 : vector<8x8xf32>
    %67 = math.exp %66 : vector<8x8xf32>
    %cst_21 = arith.constant dense<0.000000e+00> : vector<8xf32>
    %68 = vector.multi_reduction <add>, %67, %cst_21 [1] : vector<8x8xf32> to vector<8xf32>
    %69 = vector.shape_cast %68 : vector<8xf32> to vector<8x1xf32>
    %70 = tpu.reciprocal %69 {approx = true} : vector<8x1xf32> -> vector<8x1xf32>
    %71 = vector.broadcast %70 : vector<8x1xf32> to vector<8x8xf32>
    %72 = arith.mulf %67, %71 : vector<8x8xf32>
    %73 = arith.truncf %72 : vector<8x8xf32> to vector<8x8xbf16>
    %cst_22 = arith.constant dense<0.000000e+00> : vector<8x8xf32>
    %74 = tpu.matmul %73, %60, %cst_22 {dimension_numbers = #tpu.dot_dimension_numbers<[1], [0], [0], [1], [0, 0, 1, 1], [], []>} : vector<8x8xbf16>, vector<8x8xbf16>, vector<8x8xf32> -> vector<8x8xf32>
    %75 = arith.truncf %74 : vector<8x8xf32> to vector<8x8xbf16>
    %76 = vector.extract_strided_slice %14 {offsets = [16, 0], sizes = [8, 32], strides = [1, 1]} : vector<32x32xbf16> to vector<8x32xbf16>
    %cst_23 = arith.constant dense<0.000000e+00> : vector<8x32xf32>
    %77 = tpu.matmul %75, %76, %cst_23 {dimension_numbers = #tpu.dot_dimension_numbers<[1], [0], [0], [1], [0, 0, 1, 1], [], []>} : vector<8x8xbf16>, vector<8x32xbf16>, vector<8x32xf32> -> vector<8x32xf32>
    %78 = arith.addf %57, %77 : vector<8x32xf32>
    %79 = vector.extract_strided_slice %9 {offsets = [0, 24], sizes = [8, 8], strides = [1, 1]} : vector<8x32xbf16> to vector<8x8xbf16>
    %80 = vector.extract_strided_slice %11 {offsets = [0, 24], sizes = [8, 8], strides = [1, 1]} : vector<8x32xbf16> to vector<8x8xbf16>
    %81 = vector.extract_strided_slice %13 {offsets = [0, 24], sizes = [8, 8], strides = [1, 1]} : vector<8x32xbf16> to vector<8x8xbf16>
    %82 = tpu.transpose %80, [1, 0] : vector<8x8xbf16> -> vector<8x8xbf16>
    %cst_24 = arith.constant dense<0.000000e+00> : vector<8x8xf32>
    %83 = tpu.matmul %79, %82, %cst_24 {dimension_numbers = #tpu.dot_dimension_numbers<[1], [0], [0], [1], [0, 0, 1, 1], [], []>} : vector<8x8xbf16>, vector<8x8xbf16>, vector<8x8xf32> -> vector<8x8xf32>
    %cst_25 = arith.constant dense<0xFF800000> : vector<8xf32>
    %84 = vector.multi_reduction <maximumf>, %83, %cst_25 [1] : vector<8x8xf32> to vector<8xf32>
    %85 = vector.shape_cast %84 : vector<8xf32> to vector<8x1xf32>
    %86 = vector.broadcast %85 : vector<8x1xf32> to vector<8x8xf32>
    %87 = arith.subf %83, %86 : vector<8x8xf32>
    %88 = math.exp %87 : vector<8x8xf32>
    %cst_26 = arith.constant dense<0.000000e+00> : vector<8xf32>
    %89 = vector.multi_reduction <add>, %88, %cst_26 [1] : vector<8x8xf32> to vector<8xf32>
    %90 = vector.shape_cast %89 : vector<8xf32> to vector<8x1xf32>
    %91 = tpu.reciprocal %90 {approx = true} : vector<8x1xf32> -> vector<8x1xf32>
    %92 = vector.broadcast %91 : vector<8x1xf32> to vector<8x8xf32>
    %93 = arith.mulf %88, %92 : vector<8x8xf32>
    %94 = arith.truncf %93 : vector<8x8xf32> to vector<8x8xbf16>
    %cst_27 = arith.constant dense<0.000000e+00> : vector<8x8xf32>
    %95 = tpu.matmul %94, %81, %cst_27 {dimension_numbers = #tpu.dot_dimension_numbers<[1], [0], [0], [1], [0, 0, 1, 1], [], []>} : vector<8x8xbf16>, vector<8x8xbf16>, vector<8x8xf32> -> vector<8x8xf32>
    %96 = arith.truncf %95 : vector<8x8xf32> to vector<8x8xbf16>
    %97 = vector.extract_strided_slice %14 {offsets = [24, 0], sizes = [8, 32], strides = [1, 1]} : vector<32x32xbf16> to vector<8x32xbf16>
    %cst_28 = arith.constant dense<0.000000e+00> : vector<8x32xf32>
    %98 = tpu.matmul %96, %97, %cst_28 {dimension_numbers = #tpu.dot_dimension_numbers<[1], [0], [0], [1], [0, 0, 1, 1], [], []>} : vector<8x8xbf16>, vector<8x32xbf16>, vector<8x32xf32> -> vector<8x32xf32>
    %99 = arith.addf %78, %98 : vector<8x32xf32>
    %100 = arith.addf %1, %99 : vector<8x32xf32>
    %c0_29 = arith.constant 0 : index
    %c0_30 = arith.constant 0 : index
    %101 = vector.load %arg5[%c0_29, %c0_30] : memref<1x32xf32, #tpu.memory_space<vmem>>, vector<1x32xf32>
    %102 = vector.broadcast %101 : vector<1x32xf32> to vector<8x32xf32>
    %103 = arith.addf %100, %102 : vector<8x32xf32>
    %c0_31 = arith.constant 0 : index
    %c0_32 = arith.constant 0 : index
    %104 = vector.load %arg6[%c0_31, %c0_32] : memref<1x32xf32, #tpu.memory_space<vmem>>, vector<1x32xf32>
    %c0_33 = arith.constant 0 : index
    %c0_34 = arith.constant 0 : index
    %105 = vector.load %arg7[%c0_33, %c0_34] : memref<1x32xf32, #tpu.memory_space<vmem>>, vector<1x32xf32>
    %cst_35 = arith.constant dense<0.000000e+00> : vector<8xf32>
    %106 = vector.multi_reduction <add>, %103, %cst_35 [1] : vector<8x32xf32> to vector<8xf32>
    %107 = vector.shape_cast %106 : vector<8xf32> to vector<8x1xf32>
    %cst_36 = arith.constant 3.200000e+01 : f32
    %108 = vector.broadcast %cst_36 : f32 to vector<8x1xf32>
    %109 = arith.divf %107, %108 : vector<8x1xf32>
    %110 = vector.broadcast %109 : vector<8x1xf32> to vector<8x32xf32>
    %111 = arith.subf %103, %110 : vector<8x32xf32>
    %112 = arith.mulf %111, %111 : vector<8x32xf32>
    %cst_37 = arith.constant dense<0.000000e+00> : vector<8xf32>
    %113 = vector.multi_reduction <add>, %112, %cst_37 [1] : vector<8x32xf32> to vector<8xf32>
    %114 = vector.shape_cast %113 : vector<8xf32> to vector<8x1xf32>
    %cst_38 = arith.constant 3.200000e+01 : f32
    %115 = vector.broadcast %cst_38 : f32 to vector<8x1xf32>
    %116 = arith.divf %114, %115 : vector<8x1xf32>
    %117 = vector.broadcast %109 : vector<8x1xf32> to vector<8x32xf32>
    %118 = arith.subf %103, %117 : vector<8x32xf32>
    %cst_39 = arith.constant 9.99999974E-6 : f32
    %119 = vector.broadcast %cst_39 : f32 to vector<8x1xf32>
    %120 = arith.addf %116, %119 : vector<8x1xf32>
    %121 = math.rsqrt %120 : vector<8x1xf32>
    %122 = vector.broadcast %121 : vector<8x1xf32> to vector<8x32xf32>
    %123 = arith.mulf %118, %122 : vector<8x32xf32>
    %124 = vector.broadcast %104 : vector<1x32xf32> to vector<8x32xf32>
    %125 = arith.mulf %123, %124 : vector<8x32xf32>
    %126 = vector.broadcast %105 : vector<1x32xf32> to vector<8x32xf32>
    %127 = arith.addf %125, %126 : vector<8x32xf32>
    %128 = arith.truncf %127 : vector<8x32xf32> to vector<8x32xbf16>
    %c0_40 = arith.constant 0 : index
    %c0_41 = arith.constant 0 : index
    %129 = vector.load %arg8[%c0_40, %c0_41] : memref<32x128xbf16, #tpu.memory_space<vmem>>, vector<32x128xbf16>
    %cst_42 = arith.constant dense<0.000000e+00> : vector<8x128xf32>
    %130 = tpu.matmul %128, %129, %cst_42 {dimension_numbers = #tpu.dot_dimension_numbers<[1], [0], [0], [1], [0, 0, 1, 1], [], []>} : vector<8x32xbf16>, vector<32x128xbf16>, vector<8x128xf32> -> vector<8x128xf32>
    %c0_43 = arith.constant 0 : index
    %c0_44 = arith.constant 0 : index
    %131 = vector.load %arg9[%c0_43, %c0_44] : memref<1x128xf32, #tpu.memory_space<vmem>>, vector<1x128xf32>
    %132 = vector.broadcast %131 : vector<1x128xf32> to vector<8x128xf32>
    %133 = arith.addf %130, %132 : vector<8x128xf32>
    %cst_45 = arith.constant 0.000000e+00 : f32
    %134 = vector.broadcast %cst_45 : f32 to vector<8x128xf32>
    %135 = arith.maximumf %133, %134 : vector<8x128xf32>
    %136 = arith.truncf %135 : vector<8x128xf32> to vector<8x128xbf16>
    %c0_46 = arith.constant 0 : index
    %c0_47 = arith.constant 0 : index
    %137 = vector.load %arg10[%c0_46, %c0_47] : memref<128x32xbf16, #tpu.memory_space<vmem>>, vector<128x32xbf16>
    %cst_48 = arith.constant dense<0.000000e+00> : vector<8x32xf32>
    %138 = tpu.matmul %136, %137, %cst_48 {dimension_numbers = #tpu.dot_dimension_numbers<[1], [0], [0], [1], [0, 0, 1, 1], [], []>} : vector<8x128xbf16>, vector<128x32xbf16>, vector<8x32xf32> -> vector<8x32xf32>
    %c0_49 = arith.constant 0 : index
    %c0_50 = arith.constant 0 : index
    %139 = vector.load %arg11[%c0_49, %c0_50] : memref<1x32xf32, #tpu.memory_space<vmem>>, vector<1x32xf32>
    %140 = vector.broadcast %139 : vector<1x32xf32> to vector<8x32xf32>
    %141 = arith.addf %138, %140 : vector<8x32xf32>
    %142 = arith.addf %127, %141 : vector<8x32xf32>
    %c0_51 = arith.constant 0 : index
    %c0_52 = arith.constant 0 : index
    %143 = vector.load %arg12[%c0_51, %c0_52] : memref<1x32xf32, #tpu.memory_space<vmem>>, vector<1x32xf32>
    %c0_53 = arith.constant 0 : index
    %c0_54 = arith.constant 0 : index
    %144 = vector.load %arg13[%c0_53, %c0_54] : memref<1x32xf32, #tpu.memory_space<vmem>>, vector<1x32xf32>
    %cst_55 = arith.constant dense<0.000000e+00> : vector<8xf32>
    %145 = vector.multi_reduction <add>, %142, %cst_55 [1] : vector<8x32xf32> to vector<8xf32>
    %146 = vector.shape_cast %145 : vector<8xf32> to vector<8x1xf32>
    %cst_56 = arith.constant 3.200000e+01 : f32
    %147 = vector.broadcast %cst_56 : f32 to vector<8x1xf32>
    %148 = arith.divf %146, %147 : vector<8x1xf32>
    %149 = vector.broadcast %148 : vector<8x1xf32> to vector<8x32xf32>
    %150 = arith.subf %142, %149 : vector<8x32xf32>
    %151 = arith.mulf %150, %150 : vector<8x32xf32>
    %cst_57 = arith.constant dense<0.000000e+00> : vector<8xf32>
    %152 = vector.multi_reduction <add>, %151, %cst_57 [1] : vector<8x32xf32> to vector<8xf32>
    %153 = vector.shape_cast %152 : vector<8xf32> to vector<8x1xf32>
    %cst_58 = arith.constant 3.200000e+01 : f32
    %154 = vector.broadcast %cst_58 : f32 to vector<8x1xf32>
    %155 = arith.divf %153, %154 : vector<8x1xf32>
    %156 = vector.broadcast %148 : vector<8x1xf32> to vector<8x32xf32>
    %157 = arith.subf %142, %156 : vector<8x32xf32>
    %cst_59 = arith.constant 9.99999974E-6 : f32
    %158 = vector.broadcast %cst_59 : f32 to vector<8x1xf32>
    %159 = arith.addf %155, %158 : vector<8x1xf32>
    %160 = math.rsqrt %159 : vector<8x1xf32>
    %161 = vector.broadcast %160 : vector<8x1xf32> to vector<8x32xf32>
    %162 = arith.mulf %157, %161 : vector<8x32xf32>
    %163 = vector.broadcast %143 : vector<1x32xf32> to vector<8x32xf32>
    %164 = arith.mulf %162, %163 : vector<8x32xf32>
    %165 = vector.broadcast %144 : vector<1x32xf32> to vector<8x32xf32>
    %166 = arith.addf %164, %165 : vector<8x32xf32>
    %c0_60 = arith.constant 0 : index
    %c0_61 = arith.constant 0 : index
    %c0_62 = arith.constant 0 : index
    %167 = vector.load %arg14[%c0_60, %c0_61, %c0_62] : memref<1x8x32xf32, #tpu.memory_space<vmem>>, vector<1x8x32xf32>
    %168 = vector.shape_cast %167 : vector<1x8x32xf32> to vector<8x32xf32>
    %169 = vector.shape_cast %166 : vector<8x32xf32> to vector<1x8x32xf32>
    tpu.vector_store %arg14[%c0_60, %c0_61, %c0_62], %169 {strides = array<i32>} : memref<1x8x32xf32, #tpu.memory_space<vmem>>, vector<1x8x32xf32>,
    return
  }
  func.func @transform_0(%arg0: i32) -> (i32, i32, i32) {
    %c0_i32 = arith.constant 0 : i32
    %c0_i32_0 = arith.constant 0 : i32
    %c0_i32_1 = arith.constant 0 : i32
    return %arg0, %c0_i32, %c0_i32_0 : i32, i32, i32
  }
  func.func @transform_1(%arg0: i32) -> (i32, i32) {
    %c0_i32 = arith.constant 0 : i32
    %c0_i32_0 = arith.constant 0 : i32
    %c0_i32_1 = arith.constant 0 : i32
    return %c0_i32, %c0_i32_0 : i32, i32
  }
  func.func @transform_2(%arg0: i32) -> (i32, i32) {
    %c0_i32 = arith.constant 0 : i32
    %c0_i32_0 = arith.constant 0 : i32
    %c0_i32_1 = arith.constant 0 : i32
    return %c0_i32, %c0_i32_0 : i32, i32
  }
  func.func @transform_3(%arg0: i32) -> (i32, i32) {
    %c0_i32 = arith.constant 0 : i32
    %c0_i32_0 = arith.constant 0 : i32
    %c0_i32_1 = arith.constant 0 : i32
    return %c0_i32, %c0_i32_0 : i32, i32
  }
  func.func @transform_4(%arg0: i32) -> (i32, i32) {
    %c0_i32 = arith.constant 0 : i32
    %c0_i32_0 = arith.constant 0 : i32
    %c0_i32_1 = arith.constant 0 : i32
    return %c0_i32, %c0_i32_0 : i32, i32
  }
  func.func @transform_5(%arg0: i32) -> (i32, i32) {
    %c0_i32 = arith.constant 0 : i32
    %c0_i32_0 = arith.constant 0 : i32
    %c0_i32_1 = arith.constant 0 : i32
    return %c0_i32, %c0_i32_0 : i32, i32
  }
  func.func @transform_6(%arg0: i32) -> (i32, i32) {
    %c0_i32 = arith.constant 0 : i32
    %c0_i32_0 = arith.constant 0 : i32
    %c0_i32_1 = arith.constant 0 : i32
    return %c0_i32, %c0_i32_0 : i32, i32
  }
  func.func @transform_7(%arg0: i32) -> (i32, i32) {
    %c0_i32 = arith.constant 0 : i32
    %c0_i32_0 = arith.constant 0 : i32
    %c0_i32_1 = arith.constant 0 : i32
    return %c0_i32, %c0_i32_0 : i32, i32
  }
  func.func @transform_8(%arg0: i32) -> (i32, i32) {
    %c0_i32 = arith.constant 0 : i32
    %c0_i32_0 = arith.constant 0 : i32
    %c0_i32_1 = arith.constant 0 : i32
    return %c0_i32, %c0_i32_0 : i32, i32
  }
  func.func @transform_9(%arg0: i32) -> (i32, i32) {
    %c0_i32 = arith.constant 0 : i32
    %c0_i32_0 = arith.constant 0 : i32
    %c0_i32_1 = arith.constant 0 : i32
    return %c0_i32, %c0_i32_0 : i32, i32
  }
  func.func @transform_10(%arg0: i32) -> (i32, i32) {
    %c0_i32 = arith.constant 0 : i32
    %c0_i32_0 = arith.constant 0 : i32
    %c0_i32_1 = arith.constant 0 : i32
    return %c0_i32, %c0_i32_0 : i32, i32
  }
  func.func @transform_11(%arg0: i32) -> (i32, i32) {
    %c0_i32 = arith.constant 0 : i32
    %c0_i32_0 = arith.constant 0 : i32
    %c0_i32_1 = arith.constant 0 : i32
    return %c0_i32, %c0_i32_0 : i32, i32
  }
  func.func @transform_12(%arg0: i32) -> (i32, i32) {
    %c0_i32 = arith.constant 0 : i32
    %c0_i32_0 = arith.constant 0 : i32
    %c0_i32_1 = arith.constant 0 : i32
    return %c0_i32, %c0_i32_0 : i32, i32
  }
  func.func @transform_13(%arg0: i32) -> (i32, i32, i32) {
    %c0_i32 = arith.constant 0 : i32
    %c0_i32_0 = arith.constant 0 : i32
    %c0_i32_1 = arith.constant 0 : i32
    return %arg0, %c0_i32, %c0_i32_0 : i32, i32, i32
  }
}

</mosaic_0001>

<bundles_post_ra>
// kernel: tpu_custom_call.1
= control target key start
LH: loop header
LB: loop body
LE: loop exit
PB: predicated region body
PF: predicated region fallthrough
CT: control target
= control target key end

     0   :  { %s2163_s0 = inlined_call_operand.vmem [shape: f32[2,8,32], index: 0, kind: input, shape index: {}]   ;;  %s2164_s1 = inlined_call_operand.vmem [shape: bf16[32,96], index: 1, kind: input, shape index: {}]   ;;  %s2165_s2 = inlined_call_operand.vmem [shape: f32[1,96], index: 2, kind: input, shape index: {}]   ;;  %s2166_s3 = inlined_call_operand.vmem [shape: bf16[32,32], index: 3, kind: input, shape index: {}]   ;;  %s2167_s4 = inlined_call_operand.vmem [shape: f32[1,32], index: 4, kind: input, shape index: {}]   ;;  %s2168_s5 = inlined_call_operand.vmem [shape: f32[1,32], index: 5, kind: input, shape index: {}]   ;;  %s2169_s6 = inlined_call_operand.vmem [shape: f32[1,32], index: 6, kind: input, shape index: {}]   ;;  %s2170_s7 = inlined_call_operand.vmem [shape: bf16[32,128], index: 7, kind: input, shape index: {}]   ;;  %s2171_s8 = inlined_call_operand.vmem [shape: f32[1,128], index: 8, kind: input, shape index: {}]   ;;  %s2172_s9 = inlined_call_operand.vmem [shape: bf16[128,32], index: 9, kind: input, shape index: {}]   ;;  %s2173_s10 = inlined_call_operand.vmem [shape: f32[1,32], index: 10, kind: input, shape index: {}]   ;;  %s2174_s11 = inlined_call_operand.vmem [shape: f32[1,32], index: 11, kind: input, shape index: {}]   ;;  %s2175_s12 = inlined_call_operand.vmem [shape: f32[1,32], index: 12, kind: input, shape index: {}]   ;;  %s2176_s13 = inlined_call_operand.hbm [shape: f32[2,8,32], index: 13, kind: output, shape index: {}]  }
   0x1   :  { %2177 = sst [smem:[#allocation5_spill]] %s2163_s0 }
   0x2   :  { %2178 = sst [smem:[#allocation6_spill]] %s2164_s1 }
   0x3   :  { %2179 = sst [smem:[#allocation7_spill]] %s2165_s2 }
   0x4   :  { %2180 = sst [smem:[#allocation8_spill]] %s2166_s3 }
   0x5   :  { %2181 = sst [smem:[#allocation9_spill]] %s2167_s4 }
   0x6   :  { %18 = vsyncpa [#allocation3], 0 }
   0x7   :  { %20 = vsyncpa [#allocation3 + $0x1], 0  ;;  %s1886_s25 = smov 0   ;;  %s1888_s26 = smov 0  }
   0x8   :  { %s1890_s27 = smov 0   ;;  %s1892_s28 = smov 0  }
   0x9 LB: > { %s1907_s29 = sadd.s32 4294967295, %s1800_s28   ;;  %s1465_s30 = sadd.s32 4294967294, %s1800_s28   ;;  %s1800_s28 = sphi %s1892_s28, %s2192_s28   ;;  %s1796_s27 = sphi %s1890_s27, %s2191_s27   ;;  %s1792_s26 = sphi %s1888_s26, %s2190_s26   ;;  %s1788_s25 = sphi %s1886_s25, %s2189_s25  }
   0xa   : > { %s1911_s14 = sadd.s32 1, %s1800_s28   ;;  %s311_s15 = sadd.s32 1, %s1796_s27 }
   0xb   : > { %s308_s16 = ssub.s32 %s1800_s28, %s1911_s14  ;;  %p321_p0 = scmp.ne.s32.totalorder %s1796_s27, %s1792_s26 }
   0xc   : > { %p309_p1 = scmp.eq.s32.totalorder %s308_s16, 0  ;;  %p322_p2 = scmp.eq.s32.totalorder %s1907_s29, 1 }
   0xd   : > { %p327_p3 = scmp.ne.s32.totalorder %s1792_s26, %s1788_s25  ;;  %p328_p4 = scmp.eq.s32.totalorder %s1465_s30, 1 }
   0xe   : > { %s1922_s17 = scalar_select %p309_p1, %s1796_s27, %s311_s15  }
   0xf   : > { %p1924_p5 = por %p322_p2, %p321_p0  ;;  %p1928_p6 = por %p328_p4, %p327_p3 }
  0x10   : > { %p1468_p7 = scmp.ge.s32.totalorder %s1800_s28, 1  ;;  %p389_p8 = scmp.lt.s32.totalorder %s1800_s28, 3 }
  0x12   : > { %p390_p9 = pnand %p1468_p7, %p389_p8 }
  0x13   : > { %s2184_s1 = sld [smem:[#allocation6_spill]] (!%p390_p9)  ;;  %p432_p10 = scmp.lt.s32.totalorder (!%p390_p9), %s1907_s29, 1 }
  0x14   : > { %393 = sbr.rel (%p390_p9) target bundleno = 4022 (0xfb6), region = 72  ;;  %s2185_s0 = sld [smem:[#allocation5_spill]] (!%p390_p9) }
  0x15   : > { %s2186_s2 = sld [smem:[#allocation7_spill]] (!%p390_p9)  ;;  %s1804_s23 = smov (!%p390_p9), 64  }
  0x16   : > { %s1807_s15 = smov (!%p390_p9), 120   ;;  %s1808_s16 = smov (!%p390_p9), 56  }
  0x17   : > { %s1810_s21 = smov (!%p390_p9), 112   ;;  %s2187_s3 = sld [smem:[#allocation8_spill]] (!%p390_p9) }
  0x18   : > { %s2188_s4 = sld [smem:[#allocation9_spill]] (!%p390_p9)  ;;  %s1506_s22 = sshll.u32 (!%p390_p9), %s1907_s29, 7 }
  0x19   : > { %v1708_v0 = vld [vmem:[%s2184_s1 + $0x8] sm:$0xff]   ;;  %v1802_v1 = vmov 0.0   ;;  %v1709_v2 = vld [vmem:[%s2184_s1] sm:$0xff]   ;;  %vm1803_vm0 = vmmov 0   ;;  %s433_s24 = scalar_select %p432_p10, %s1907_s29, 1  ;;  %vm462_vm1 = vcmask 261120  }
  0x1a   : > { %1548 = vmatprep.subr.bf16.mxu1 %v1802_v1  ;;  %1574 = vmatprep.subr.bf16.mxu0 %v1802_v1  ;;  %vm514_vm2 = vcmask 64512   ;;  %vm578_vm3 = vcmask 1043456  }
  0x1b   : > { %1549 = vmatpush3.bf16.msra.mxu1 %v1708_v0  ;;  %1552 = vmatprep.mubr.msk.bf16.mxu1 %vm1803_vm0, %v1802_v1  ;;  %s1470_s30 = sshll.u32 %s433_s24, 3  ;;  %v1471_v5 = vld [vmem:[%s2186_s2] ss:$0 sm:$0xff]  ;;  %s1805_s24 = smov 96  }
  0x1c   : > { %1550 = vmatprep.subr.bf16.mxu1 %v1802_v1  ;;  %1576 = vmatprep.mubr.msk.bf16.mxu0 %vm1803_vm0, %v1802_v1  ;;  %s435_s20 = scalar_lea.vmem %s2185_s0, %s1470_s30  ;;  %s1806_s30 = smov 88  }
  0x1d   : > { %v1953_v3 = vld [vmem:[%s435_s20] sm:$0xff]  ;;  %s1809_s20 = smov 80  }
  0x1e   : > { %v438_v4 = vpack.c.bf16 %v1953_v3, %v1953_v3  ;;  %v508_v47 = vld [vmem:[%s2187_s3 + $0x4] sm:$0xf]  ;;  %v507_v53 = vld [vmem:[%s2187_s3] sm:$0xf] }
  0x1f   : > { %1551 = vmatpush3.bf16.msra.mxu1 %v1709_v2  ;;  %v738_v48 = vsel %vm578_vm3, %v508_v47, 0  ;;  %v784_v56 = vsel %vm578_vm3, %v507_v53, 0 }
  0x20   : > { %1556 = vmatprep.subr.bf16.mxu1 %v1802_v1 }
  0x22   : > { %1553 = vmatmul.mubr.msk.bf16.vlgmr.msra.gmra.mxu1 %vm462_vm1, %v438_v4 }
  0x23   : > { %1558 = vmatprep.mubr.msk.bf16.mxu1 %vm1803_vm0, %v1802_v1 }
  0xe2   : > { %v500_v6 = vpop.f32.mrf.mxu1 }
  0xe3   : > { %v501_v7 = vadd.f32 %v1471_v5, %v500_v6 }
  0xe4   : > { %v1554_v8 = vpop.f32.mrf.mxu1 }
  0xe5   : > { %v1963_v9 = vpack.c.bf16 %v501_v7, %v501_v7 }
  0xe6   : > { %v503_v10 = vpop.f32.mrf.mxu1 }
  0xe7   : > { %573 = vrot.lane.b32.xlu1 %v1963_v9, %s1804_s23  ;;  %512 = vrot.lane.b32.xlu0 %v1963_v9, %s1805_s24  ;;  %s1814_s23 = smov 40   ;;  %s429_s24 = sand.u32 1, %s1792_s26  }
  0xe8   : > { %v1555_v11 = vpop.f32.mrf.mxu1 }
 0x159   : > { %v513_v12 = vpop.permute.xlu0 %512  ;;  %v574_v14 = vpop.permute.xlu1 %573 }
 0x15a   : > { %v519_v13 = vsel %vm514_vm2, %v513_v12, 0  ;;  %v580_v15 = vsel %vm578_vm3, %v574_v14, 0 }
 0x15b   : > { %1557 = vmatpush3.bf16.xpose.msra.mxu1 %v519_v13 }
 0x15c   : > { %1562 = vmatprep.subr.bf16.mxu1 %v1802_v1 }
 0x162   : > { %1559 = vmatmul.mubr.msk.bf16.vlgmr.msra.gmra.mxu1 %vm514_vm2, %v1963_v9 }
 0x163   : > { %1563 = vmatpush3.bf16.msra.mxu1 %v580_v15  ;;  %1564 = vmatprep.mubr.msk.bf16.mxu1 %vm1803_vm0, %v1802_v1 }
 0x164   : > { %1568 = vmatprep.subr.bf16.mxu1 %v1802_v1 }
 0x222   : > { %v555_v16 = vpop.f32.mrf.mxu1 }
 0x223   : > { %v561_v17 = vsel %vm514_vm2, %v555_v16, -inf }
 0x224   : > { %562 = vmax.xlane.f32.xlu0 %v561_v17  ;;  %v1560_v18 = vpop.f32.mrf.mxu1 }
 0x226   : > { %v558_v19 = vpop.f32.mrf.mxu1 }
 0x228   : > { %v1561_v20 = vpop.f32.mrf.mxu1 }
 0x2ad   : > { %v563_v21 = vpop.xlane.xlu0 %562 }
 0x2ae   : > { %v564_v22 = vsub.f32 %v555_v16, %v563_v21 }
 0x2b0   : > { %v565_v23 = vmul.f32 1.442695, %v564_v22 }
 0x2b2   : > { %1720 = vpow2.f32 %v565_v23 }
 0x2bf   : > { %v1721_v24 = vpop.eup %1720 }
 0x2c0   : > { %v567_v25 = vsel %vm514_vm2, %v1721_v24, 0.0 }
 0x2c1   : > { %568 = vadd.xlane.f32.xlu1 %v567_v25 }
 0x2d2   : > { %625 = vrot.lane.b32.xlu1 %v1963_v9, %s1806_s30  ;;  %s1469_s30 = sshll.u32 %s429_s24, 3 }
 0x2d6   : > { %623 = vrot.lane.b32.xlu1 %v1963_v9, %s1807_s15  ;;  %s1811_s15 = smov 48  }
 0x34a   : > { %v569_v26 = vpop.xlane.xlu1 %568 }
 0x34b   : > { %1722 = vrcp.f32 %v569_v26 }
 0x34e   : > { %v626_v29 = vpop.permute.xlu1 %625 }
 0x34f   : > { %v631_v31 = vsel %vm514_vm2, %v626_v29, 0 }
 0x352   : > { %v624_v32 = vpop.permute.xlu1 %623 }
 0x358   : > { %v1723_v27 = vpop.eup %1722 }
 0x359   : > { %v571_v28 = vmul.f32 %v1723_v27, %v1721_v24 }
 0x35b   : > { %v572_v30 = vpack.c.bf16 %v571_v28, %v571_v28 }
 0x35d   : > { %1565 = vmatmul.mubr.msk.bf16.vlgmr.msra.gmra.mxu1 %vm514_vm2, %v572_v30 }
 0x35e   : > { %1569 = vmatpush3.bf16.xpose.msra.mxu1 %v631_v31  ;;  %1570 = vmatprep.mubr.msk.bf16.mxu1 %vm1803_vm0, %v1802_v1 }
 0x35f   : > { %1580 = vmatprep.subr.bf16.mxu1 %v1802_v1 }
 0x365   : > { %1571 = vmatmul.mubr.msk.bf16.vlgmr.msra.gmra.mxu1 %vm514_vm2, %v624_v32  ;;  %v509_v32 = vld [vmem:[%s2187_s3 + $0x8] sm:$0xf] }
 0x366   : > { %1582 = vmatprep.mubr.msk.bf16.mxu1 %vm1803_vm0, %v1802_v1  ;;  %1581 = vmatpush3.bf16.msra.mxu1 %v738_v48 }
 0x367   : > { %1592 = vmatprep.subr.bf16.mxu1 %v1802_v1 }
 0x41d   : > { %v616_v33 = vpop.f32.mrf.mxu1 }
 0x41e   : > { %v622_v57 = vpack.c.bf16 %v616_v33, %v616_v33  ;;  %v941_v33 = vsel %vm578_vm3, %v509_v32, 0 }
 0x41f   : > { %v1566_v34 = vpop.f32.mrf.mxu1 }
 0x421   : > { %v619_v35 = vpop.f32.mrf.mxu1 }
 0x423   : > { %v1567_v36 = vpop.f32.mrf.mxu1 }
 0x425   : > { %v667_v37 = vpop.f32.mrf.mxu1 }
 0x426   : > { %v673_v38 = vsel %vm514_vm2, %v667_v37, -inf }
 0x427   : > { %674 = vmax.xlane.f32.xlu1 %v673_v38  ;;  %v1572_v39 = vpop.f32.mrf.mxu1 }
 0x429   : > { %v670_v40 = vpop.f32.mrf.mxu1 }
 0x42b   : > { %v1573_v41 = vpop.f32.mrf.mxu1 }
 0x4b0   : > { %v675_v42 = vpop.xlane.xlu1 %674 }
 0x4b1   : > { %v676_v43 = vsub.f32 %v667_v37, %v675_v42 }
 0x4b3   : > { %v677_v44 = vmul.f32 1.442695, %v676_v43 }
 0x4b5   : > { %1724 = vpow2.f32 %v677_v44 }
 0x4c2   : > { %v1725_v45 = vpop.eup %1724 }
 0x4c3   : > { %v679_v46 = vsel %vm514_vm2, %v1725_v45, 0.0 }
 0x4c4   : > { %680 = vadd.xlane.f32.xlu0 %v679_v46 }
 0x4da   : > { %685 = vrot.lane.b32.xlu0 %v1963_v9, %s1808_s16  ;;  %s1812_s16 = smov 72  }
 0x4de   : > { %828 = vrot.lane.b32.xlu0 %v1963_v9, %s1809_s20  ;;  %s1813_s20 = smov 104  }
 0x4e2   : > { %826 = vrot.lane.b32.xlu0 %v1963_v9, %s1810_s21 }
 0x54d   : > { %v681_v49 = vpop.xlane.xlu0 %680 }
 0x54e   : > { %1726 = vrcp.f32 %v681_v49 }
 0x551   : > { %v686_v50 = vpop.permute.xlu0 %685 }
 0x552   : > { %v691_v51 = vsel %vm578_vm3, %v686_v50, 0 }
 0x553   : > { %1575 = vmatpush3.bf16.msra.mxu0 %v691_v51  ;;  %v510_v51 = vld [vmem:[%s2187_s3 + $0xc] sm:$0xf]  ;;  %s1404_s3 = scalar_lea.hbm %s2176_s13, %s1506_s22 }
 0x554   : > { %1586 = vmatprep.subr.bf16.mxu0 %v1802_v1  ;;  %v1099_v53 = vsel %vm578_vm3, %v510_v51, 0 }
 0x555   : > { %v829_v58 = vpop.permute.xlu0 %828 }
 0x556   : > { %v834_v62 = vsel %vm514_vm2, %v829_v58, 0 }
 0x559   : > { %v827_v4 = vpop.permute.xlu0 %826 }
 0x55b   : > { %v1727_v52 = vpop.eup %1726 }
 0x55c   : > { %v683_v54 = vmul.f32 %v1727_v52, %v1725_v45 }
 0x55e   : > { %v684_v55 = vpack.c.bf16 %v683_v54, %v683_v54 }
 0x560   : > { %1577 = vmatmul.mubr.msk.bf16.vlgmr.msra.gmra.mxu0 %vm514_vm2, %v684_v55 }
 0x561   : > { %1587 = vmatpush3.bf16.msra.mxu0 %v784_v56  ;;  %1588 = vmatprep.mubr.msk.bf16.mxu0 %vm1803_vm0, %v1802_v1 }
 0x562   : > { %1598 = vmatprep.subr.bf16.mxu0 %v1802_v1 }
 0x568   : > { %1589 = vmatmul.mubr.msk.bf16.vlgmr.msra.gmra.mxu0 %vm514_vm2, %v622_v57 }
 0x569   : > { %1600 = vmatprep.mubr.msk.bf16.mxu0 %vm1803_vm0, %v1802_v1 }
 0x620   : > { %v727_v59 = vpop.f32.mrf.mxu0 }
 0x621   : > { %v733_v60 = vpack.c.bf16 %v727_v59, %v727_v59 }
 0x622   : > { %v1578_v61 = vpop.f32.mrf.mxu0 }
 0x623   : > { %1583 = vmatmul.mubr.msk.bf16.vlgmr.msra.gmra.mxu1 %vm514_vm2, %v733_v60 }
 0x624   : > { %1593 = vmatpush3.bf16.xpose.msra.mxu1 %v834_v62  ;;  %v730_v63 = vpop.f32.mrf.mxu0  ;;  %1594 = vmatprep.mubr.msk.bf16.mxu1 %vm1803_vm0, %v1802_v1 }
 0x625   : > { %1604 = vmatprep.subr.bf16.mxu1 %v1802_v1 }
 0x626   : > { %v1579_v0 = vpop.f32.mrf.mxu0 }
 0x628   : > { %v2015_v2 = vpop.f32.mrf.mxu0 }
 0x62a   : > { %v1590_v5 = vpop.f32.mrf.mxu0 }
 0x62b   : > { %1595 = vmatmul.mubr.msk.bf16.vlgmr.msra.gmra.mxu1 %vm514_vm2, %v827_v4 }
 0x62c   : > { %v823_v6 = vpop.f32.mrf.mxu0  ;;  %1606 = vmatprep.mubr.msk.bf16.mxu1 %vm1803_vm0, %v1802_v1  ;;  %1605 = vmatpush3.bf16.msra.mxu1 %v941_v33  ;;  %v1489_v33 = vld [vmem:[%s2169_s6] ss:$0 sm:$0xff] }
 0x62d   : > { %1616 = vmatprep.subr.bf16.mxu1 %v1802_v1 }
 0x62e   : > { %v1591_v7 = vpop.f32.mrf.mxu0 }
 0x6e3   : > { %v2020_v8 = vpop.f32.mrf.mxu1 }
 0x6e4   : > { %v821_v49 = vadd.f32 %v2015_v2, %v2020_v8  ;;  %v1487_v8 = vld [vmem:[%s2188_s4] ss:$0 sm:$0xff]  ;;  %s1393_s4 = scalar_lea.sflag [#allocation3], %s429_s24 }
 0x6e5   : > { %v1584_v10 = vpop.f32.mrf.mxu1 }
 0x6e7   : > { %v777_v11 = vpop.f32.mrf.mxu1 }
 0x6e9   : > { %v1585_v12 = vpop.f32.mrf.mxu1 }
 0x6eb   : > { %v870_v13 = vpop.f32.mrf.mxu1 }
 0x6ec   : > { %v876_v14 = vsel %vm514_vm2, %v870_v13, -inf }
 0x6ed   : > { %877 = vmax.xlane.f32.xlu1 %v876_v14  ;;  %v1596_v15 = vpop.f32.mrf.mxu1 }
 0x6ef   : > { %v873_v16 = vpop.f32.mrf.mxu1 }
 0x6f1   : > { %v1597_v17 = vpop.f32.mrf.mxu1 }
 0x6fe   : > { %888 = vrot.lane.b32.xlu1 %v1963_v9, %s1811_s15 }
 0x702   : > { %986 = vrot.lane.b32.xlu1 %v1963_v9, %s1812_s16  ;;  %s1815_s16 = smov [#allocation2]  }
 0x706   : > { %984 = vrot.lane.b32.xlu1 %v1963_v9, %s1813_s20  ;;  %s1744_s20 = sshll.u32 %s1815_s16, 4  ;;  %s1745_s20 = int_to_ptr.vmem [resolvable:$false] %s1744_s20 }
 0x707   : > { %s1746_s29 = scalar_lea.vmem %s1745_s20, 256 }
 0x776   : > { %v878_v18 = vpop.xlane.xlu1 %877 }
 0x777   : > { %v879_v19 = vsub.f32 %v870_v13, %v878_v18 }
 0x779   : > { %v880_v20 = vmul.f32 1.442695, %v879_v19 }
 0x77a   : > { %v889_v21 = vpop.permute.xlu1 %888 }
 0x77b   : > { %1728 = vpow2.f32 %v880_v20  ;;  %v894_v22 = vsel %vm578_vm3, %v889_v21, 0  ;;  %v1710_v20 = vld [vmem:[%s2170_s7 + $0x8] sm:$0xff]   ;;  %v1712_v21 = vld [vmem:[%s2172_s9 + $0x38] sm:$0xff]  }
 0x77c   : > { %1599 = vmatpush3.bf16.msra.mxu0 %v894_v22  ;;  %v1713_v22 = vld [vmem:[%s2172_s9 + $0x30] sm:$0xff]  }
 0x77d   : > { %1610 = vmatprep.subr.bf16.mxu0 %v1802_v1 }
 0x77e   : > { %v987_v28 = vpop.permute.xlu1 %986 }
 0x77f   : > { %v992_v30 = vsel %vm514_vm2, %v987_v28, 0 }
 0x782   : > { %v985_v31 = vpop.permute.xlu1 %984 }
 0x788   : > { %v1729_v23 = vpop.eup %1728 }
 0x789   : > { %v882_v24 = vsel %vm514_vm2, %v1729_v23, 0.0 }
 0x78a   : > { %883 = vadd.xlane.f32.xlu0 %v882_v24  ;;  %v1715_v24 = vld [vmem:[%s2172_s9 + $0x20] sm:$0xff]  }
 0x813   : > { %v884_v25 = vpop.xlane.xlu0 %883 }
 0x814   : > { %1730 = vrcp.f32 %v884_v25  ;;  %v1716_v25 = vld [vmem:[%s2172_s9 + $0x18] sm:$0xff]  }
 0x821   : > { %v1731_v26 = vpop.eup %1730 }
 0x822   : > { %v886_v27 = vmul.f32 %v1731_v26, %v1729_v23  ;;  %v1714_v23 = vld [vmem:[%s2172_s9 + $0x28] sm:$0xff]   ;;  %v1717_v26 = vld [vmem:[%s2172_s9 + $0x10] sm:$0xff]  }
 0x824   : > { %v887_v29 = vpack.c.bf16 %v886_v27, %v886_v27 }
 0x826   : > { %1601 = vmatmul.mubr.msk.bf16.vlgmr.msra.gmra.mxu0 %vm514_vm2, %v887_v29 }
 0x827   : > { %1611 = vmatpush3.bf16.xpose.msra.mxu0 %v992_v30  ;;  %1612 = vmatprep.mubr.msk.bf16.mxu0 %vm1803_vm0, %v1802_v1 }
 0x828   : > { %1622 = vmatprep.subr.bf16.mxu0 %v1802_v1 }
 0x82e   : > { %1613 = vmatmul.mubr.msk.bf16.vlgmr.msra.gmra.mxu0 %vm514_vm2, %v985_v31  ;;  %v1488_v31 = vld [vmem:[%s2168_s5] ss:$0 sm:$0xff] }
 0x82f   : > { %1624 = vmatprep.mubr.msk.bf16.mxu0 %vm1803_vm0, %v1802_v1  ;;  %1623 = vmatpush3.bf16.msra.mxu0 %v1099_v53 }
 0x830   : > { %1636 = vmatprep.subr.bf16.mxu0 %v1802_v1 }
 0x8e6   : > { %v930_v34 = vpop.f32.mrf.mxu0 }
 0x8e7   : > { %v936_v35 = vpack.c.bf16 %v930_v34, %v930_v34 }
 0x8e8   : > { %v1602_v36 = vpop.f32.mrf.mxu0 }
 0x8e9   : > { %1607 = vmatmul.mubr.msk.bf16.vlgmr.msra.gmra.mxu1 %vm514_vm2, %v936_v35 }
 0x8ea   : > { %v933_v37 = vpop.f32.mrf.mxu0  ;;  %1618 = vmatprep.mubr.msk.bf16.mxu1 %vm1803_vm0, %v1802_v1 }
 0x8eb   : > { %v1718_v37 = vld [vmem:[%s2172_s9 + $0x8] sm:$0xff]  }
 0x8ec   : > { %v1603_v38 = vpop.f32.mrf.mxu0 }
 0x8ed   : > { %v1719_v38 = vld [vmem:[%s2172_s9] sm:$0xff]  }
 0x8ee   : > { %v1028_v39 = vpop.f32.mrf.mxu0 }
 0x8ef   : > { %v1034_v40 = vsel %vm514_vm2, %v1028_v39, -inf }
 0x8f0   : > { %1035 = vmax.xlane.f32.xlu1 %v1034_v40  ;;  %v1614_v41 = vpop.f32.mrf.mxu0 }
 0x8f2   : > { %v1031_v42 = vpop.f32.mrf.mxu0 }
 0x8f4   : > { %v1615_v43 = vpop.f32.mrf.mxu0 }
 0x979   : > { %v1036_v44 = vpop.xlane.xlu1 %1035 }
 0x97a   : > { %v1037_v45 = vsub.f32 %v1028_v39, %v1036_v44  ;;  %v1490_v39 = vld [vmem:[%s2171_s8] ss:$0 sm:$0xff] }
 0x97c   : > { %v1038_v46 = vmul.f32 1.442695, %v1037_v45 }
 0x97e   : > { %1732 = vpow2.f32 %v1038_v46 }
 0x98b   : > { %v1733_v47 = vpop.eup %1732 }
 0x98c   : > { %v1040_v48 = vsel %vm514_vm2, %v1733_v47, 0.0 }
 0x98d   : > { %1041 = vadd.xlane.f32.xlu0 %v1040_v48 }
 0x9a3   : > { %1046 = vrot.lane.b32.xlu0 %v1963_v9, %s1814_s23  ;;  %s431_s23 = scalar_lea.vmem [#allocation2], %s1469_s30 }
 0x9a4   : > { %s1406_s0 = sshll.u32 %s431_s23, 4  ;;  %s1407_s0 = int_to_ptr.vmem [resolvable:$true] %s1406_s0 }
 0x9a5   : > { %s1740_s15 = scalar_lea.vmem %s1407_s0, 128  ;;  %p1747_p0 = scmp.lt.s32.totalorder %s1407_s0, %s1745_s20 }
 0x9a6   : > { %p1741_p11 = scmp.ne.s32.totalorder %s1407_s0, %s1740_s15  ;;  %p1748_p1 = scmp.lt.s32.totalorder %s1746_s29, %s1740_s15 }
 0x9a8   : > { %p1742_p12 = pnand %p1741_p11, %p1924_p5  ;;  %p1749_p2 = por %p1748_p1, %p1747_p0 }
 0x9a9   : > { %v977_v50 = vpop.f32.mrf.mxu1 }
 0x9aa   : > { %v983_v52 = vadd.f32 %v977_v50, %v821_v49  ;;  %p1743_p13 = pneg %p1742_p12 }
 0x9ab   : > { %v1608_v54 = vpop.f32.mrf.mxu1 }
 0x9ac   : > { %p1750_p3 = pnand %p1749_p2, %p1743_p13 }
 0x9ad   : > { %v980_v55 = vpop.f32.mrf.mxu1 }
 0x9af   : > { %v1609_v56 = vpop.f32.mrf.mxu1 }
 0xa16   : > { %v1042_v57 = vpop.xlane.xlu0 %1041 }
 0xa17   : > { %1734 = vrcp.f32 %v1042_v57 }
 0xa1a   : > { %v1047_v9 = vpop.permute.xlu0 %1046 }
 0xa1b   : > { %v1052_v58 = vsel %vm578_vm3, %v1047_v9, 0 }
 0xa1c   : > { %1617 = vmatpush3.bf16.msra.mxu1 %v1052_v58 }
 0xa1d   : > { %1628 = vmatprep.subr.bf16.mxu1 %v1802_v1 }
 0xa24   : > { %v1735_v59 = vpop.eup %1734 }
 0xa25   : > { %v1044_v60 = vmul.f32 %v1735_v59, %v1733_v47 }
 0xa27   : > { %v1045_v61 = vpack.c.bf16 %v1044_v60, %v1044_v60 }
 0xa29   : > { %1619 = vmatmul.mubr.msk.bf16.vlgmr.msra.gmra.mxu1 %vm514_vm2, %v1045_v61 }
 0xa2a   : > { %1632 = vmatprep.mubr.msk.bf16.mxu1 %vm1803_vm0, %v1802_v1  ;;  %1629 = vmatpush3.bf16.msra.mxu1 %v1710_v20 }
 0xa2b   : > { %1630 = vmatprep.subr.bf16.mxu1 %v1802_v1 }
 0xae9   : > { %v1088_v62 = vpop.f32.mrf.mxu1 }
 0xaea   : > { %v1094_v63 = vpack.c.bf16 %v1088_v62, %v1088_v62  ;;  %v1503_v62 = vld [vmem:[%s2174_s11] ss:$0 sm:$0xff] }
 0xaeb   : > { %v1620_v0 = vpop.f32.mrf.mxu1 }
 0xaec   : > { %1625 = vmatmul.mubr.msk.bf16.vlgmr.msra.gmra.mxu0 %vm514_vm2, %v1094_v63  ;;  %v1504_v0 = vld [vmem:[%s2175_s12] ss:$0 sm:$0xff] }
 0xaed   : > { %v1091_v2 = vpop.f32.mrf.mxu1  ;;  %1652 = vmatprep.mubr.msk.bf16.mxu0 %vm1803_vm0, %v1802_v1  ;;  %1637 = vmatpush3.bf16.msra.mxu0 %v1712_v21 }
 0xaee   : > { %1638 = vmatprep.subr.bf16.mxu0 %v1802_v1 }
 0xaef   : > { %v1621_v4 = vpop.f32.mrf.mxu1 }
 0xaf1   : > { %1639 = vmatpush3.bf16.msra.mxu0 %v1713_v22 }
 0xaf2   : > { %1640 = vmatprep.subr.bf16.mxu0 %v1802_v1 }
 0xaf5   : > { %1641 = vmatpush3.bf16.msra.mxu0 %v1714_v23 }
 0xaf6   : > { %1642 = vmatprep.subr.bf16.mxu0 %v1802_v1 }
 0xaf9   : > { %1643 = vmatpush3.bf16.msra.mxu0 %v1715_v24 }
 0xafa   : > { %1644 = vmatprep.subr.bf16.mxu0 %v1802_v1 }
 0xafd   : > { %1645 = vmatpush3.bf16.msra.mxu0 %v1716_v25 }
 0xafe   : > { %1646 = vmatprep.subr.bf16.mxu0 %v1802_v1 }
 0xb01   : > { %1647 = vmatpush3.bf16.msra.mxu0 %v1717_v26 }
 0xb02   : > { %1648 = vmatprep.subr.bf16.mxu0 %v1802_v1 }
 0xb05   : > { %1649 = vmatpush3.bf16.msra.mxu0 %v1718_v37 }
 0xb06   : > { %1650 = vmatprep.subr.bf16.mxu0 %v1802_v1  ;;  %v1494_v1 = vld [vmem:[%s2173_s10] ss:$0 sm:$0xff] }
 0xb09   : > { %1651 = vmatpush3.bf16.msra.mxu0 %v1719_v38 }
 0xbac   : > { %v1135_v5 = vpop.f32.mrf.mxu0 }
 0xbad   : > { %v1141_v6 = vadd.f32 %v1135_v5, %v983_v52 }
 0xbae   : > { %v1626_v7 = vpop.f32.mrf.mxu0 }
 0xbaf   : > { %v1142_v10 = vadd.f32 %v1141_v6, %v1953_v3  ;;  %v1711_v3 = vld [vmem:[%s2170_s7] sm:$0xff]  }
 0xbb0   : > { %v1138_v11 = vpop.f32.mrf.mxu0  ;;  %1631 = vmatpush3.bf16.msra.mxu1 %v1711_v3 }
 0xbb1   : > { %v1150_v12 = vadd.f32 %v1487_v8, %v1142_v10 }
 0xbb2   : > { %v1627_v13 = vpop.f32.mrf.mxu0 }
 0xbb3   : > { %v1153_v14 = vsel %vm462_vm1, %v1150_v12, 0.0 }
 0xbb4   : > { %1154 = vadd.xlane.f32.xlu0 %v1153_v14 }
 0xc3d   : > { %v1155_v15 = vpop.xlane.xlu0 %1154 }
 0xc3e   : > { %v1157_v16 = vmul.f32 0.03125, %v1155_v15 }
 0xc40   : > { %v1158_v17 = vsub.f32 %v1150_v12, %v1157_v16 }
 0xc42   : > { %v1159_v18 = vmul.f32 %v1158_v17, %v1158_v17 }
 0xc44   : > { %v1160_v19 = vsel %vm462_vm1, %v1159_v18, 0.0 }
 0xc45   : > { %1161 = vadd.xlane.f32.xlu1 %v1160_v19 }
 0xcce   : > { %v1162_v27 = vpop.xlane.xlu1 %1161 }
 0xccf   : > { %v1163_v28 = vmul.f32 0.03125, %v1162_v27 }
 0xcd1   : > { %v1164_v29 = vadd.f32 1e-05, %v1163_v28 }
 0xcd3   : > { %1736 = vrsqrt.f32 %v1164_v29 }
 0xce0   : > { %v1737_v30 = vpop.eup %1736 }
 0xce1   : > { %v1166_v32 = vmul.f32 %v1737_v30, %v1158_v17 }
 0xce3   : > { %v1173_v34 = vmul.f32 %v1488_v31, %v1166_v32 }
 0xce5   : > { %v1180_v35 = vadd.f32 %v1489_v33, %v1173_v34 }
 0xce7   : > { %v1181_v36 = vpack.c.bf16 %v1180_v35, %v1180_v35 }
 0xce9   : > { %1633 = vmatmul.mubr.msk.bf16.vlgmr.msra.gmra.mxu1 %vm462_vm1, %v1181_v36 }
 0xda9   : > { %v1242_v40 = vpop.f32.mrf.mxu1 }
 0xdaa   : > { %v1243_v41 = vadd.f32 %v1490_v39, %v1242_v40 }
 0xdab   : > { %v1634_v42 = vpop.f32.mrf.mxu1 }
 0xdac   : > { %v1248_v43 = vmax.f32 %v1243_v41, 0.0 }
 0xdad   : > { %v1245_v44 = vpop.f32.mrf.mxu1 }
 0xdae   : > { %v1249_v45 = vpack.c.bf16 %v1248_v43, %v1248_v43 }
 0xdaf   : > { %v1635_v46 = vpop.f32.mrf.mxu1 }
 0xdb0   : > { %1653 = vmatmul.mubr.bf16.vlgmr.msra.gmra.mxu0 %v1249_v45 }
 0xe70   : > { %v1355_v47 = vpop.f32.mrf.mxu0 }
 0xe71   : > { %v1356_v48 = vadd.f32 %v1494_v1, %v1355_v47 }
 0xe72   : > { %v1654_v49 = vpop.f32.mrf.mxu0 }
 0xe73   : > { %v1361_v50 = vadd.f32 %v1356_v48, %v1180_v35 }
 0xe74   : > { %v1358_v51 = vpop.f32.mrf.mxu0 }
 0xe75   : > { %v1364_v52 = vsel %vm462_vm1, %v1361_v50, 0.0 }
 0xe76   : > { %1365 = vadd.xlane.f32.xlu1 %v1364_v52  ;;  %v1655_v53 = vpop.f32.mrf.mxu0 }
 0xeff   : > { %v1366_v54 = vpop.xlane.xlu1 %1365 }
 0xf00   : > { %v1367_v55 = vmul.f32 0.03125, %v1366_v54 }
 0xf02   : > { %v1368_v56 = vsub.f32 %v1361_v50, %v1367_v55 }
 0xf04   : > { %v1369_v57 = vmul.f32 %v1368_v56, %v1368_v56 }
 0xf06   : > { %v1370_v9 = vsel %vm462_vm1, %v1369_v57, 0.0 }
 0xf07   : > { %1371 = vadd.xlane.f32.xlu1 %v1370_v9 }
 0xf90   : > { %v1372_v58 = vpop.xlane.xlu1 %1371 }
 0xf91   : > { %v1373_v59 = vmul.f32 0.03125, %v1372_v58 }
 0xf93   : > { %v1374_v60 = vadd.f32 1e-05, %v1373_v59 }
 0xf95   : > { %1738 = vrsqrt.f32 %v1374_v60 }
 0xfa2   : > { %v1739_v61 = vpop.eup %1738 }
 0xfa3   : > { %v1376_v63 = vmul.f32 %v1739_v61, %v1368_v56 }
 0xfa5   : > { %v1383_v2 = vmul.f32 %v1503_v62, %v1376_v63 }
 0xfa7   : > { %v1390_v4 = vadd.f32 %v1504_v0, %v1383_v2 }
 0xfa9   : > { %1391 = vst.msk [vmem:[%s431_s23] sm:$0xff] %vm462_vm1, %v1390_v4 }
 0xfaa   : > { %1753 = shalt.err (!%p1750_p3)
}
 0xfab   : > { %s1754_s1 = scalar_lea.hbm %s1404_s3, 128  ;;  %s1758_s30 = scalar_lea.hbm %s2176_s13, 256 }
 0xfac   : > { %p1755_p4 = scmp.ne.s32.totalorder %s1404_s3, %s1754_s1  ;;  %p1759_p9 = scmp.lt.s32.totalorder %s1404_s3, %s2176_s13 }
 0xfad   : > { %p1760_p10 = scmp.lt.s32.totalorder %s1758_s30, %s1754_s1 }
 0xfae   : > { %p1756_p7 = pnand %p1755_p4, %p1924_p5 }
 0xfaf   : > { %p1761_p11 = por %p1760_p10, %p1759_p9 }
 0xfb0   : > { %p1757_p8 = pneg %p1756_p7 }
 0xfb2   : > { %p1762_p12 = pnand %p1761_p11, %p1757_p8 }
 0xfb4   : > { %1765 = shalt.err (!%p1762_p12)
}
 0xfb5   : > { %1656 = dma.vmem_to_hbm [thread:$0]  (%p1924_p5), %s1407_s0, 128, %s1404_s3, %s1393_s4  }
 0xfb6 PF: > { %p1662_p13 = scmp.ge.s32.totalorder %s1800_s28, 2  ;;  %s1418_s23 = sand.u32 1, %s1788_s25  }
 0xfb7   : > { %s1419_s15 = scalar_lea.sflag [#allocation3], %s1418_s23 }
 0xfb8   : > { %p1659_p0 = pnand %p1662_p13, %p1928_p6 }
 0xfba   : > { %p1660_p1 = pneg %p1659_p0 }
 0xfbc   : > { %1783 = dma.done.wait (%p1660_p1), %s1419_s15, 128  }
 0xfbd   : > { %1785 = vsyncadd (%p1660_p1), %s1419_s15, 4294967168  ;;  %p23_p2 = scmp.ge.s32.totalorder %s1911_s14, 4   ;;  %s2189_s25 = smov %s1792_s26 }
 0xfbe   : > { %s2190_s26 = smov %s1796_s27  ;;  %s2191_s27 = smov %s1922_s17 }
 0xfbf   : > { %s2192_s28 = smov %s1911_s14  ;;  %25 = sbr.rel (!%p23_p2) target bundleno = 9 (0x9), region = 107 }
 0xfc4   :  { %1424 = vsyncpa [#allocation3], 1 }
 0xfc5   :  { %1426 = vsyncpa [#allocation3 + $0x1], 1 }

</bundles_post_ra>
